<compile_context>
chip_gen: v5e
topology: v5e:2x2
jax: 0.10.0
libtpu: 0.0.40
codegen_flags: <defaults>
</compile_context>

<pallas_src>
import functools
from typing import NamedTuple

import numpy as np
import jax
import jax.numpy as jnp
from jax.experimental import pallas as pl
from jax.experimental.pallas import tpu as pltpu


# ----------------------------------------------------------------------------
# Per-generation tiling parameters
# ----------------------------------------------------------------------------
def _tpu_params():
    """(num_tensorcores, per-operand block budget, vmem_limit_bytes)."""
    try:
        kind = jax.devices()[0].device_kind.lower()
    except Exception:
        kind = ""
    if "v7" in kind:                       # 2 TCs, 64 MiB physical VMEM
        return 2, 3 << 20, 48 << 20
    if "v4" in kind or "v5p" in kind:      # megacore chips, 128 MiB VMEM
        return 2, 6 << 20, 64 << 20
    return 1, 6 << 20, 64 << 20            # v5e / v6e: 1 TC, 128 MiB VMEM


_NUM_TC, _BLOCK_BUDGET, _VMEM_LIMIT = _tpu_params()
_CPARAMS = pltpu.CompilerParams(dimension_semantics=("parallel",),
                                vmem_limit_bytes=_VMEM_LIMIT)
_SMEM_SPEC = pl.BlockSpec(memory_space=pltpu.MemorySpace.SMEM)


def _row_tile(rows, lane, itemsize=4):
    """Row tile (multiple of 8, VMEM-budgeted) for a (rows, lane) flat view."""
    if rows <= 8:
        return rows                         # full-extent block (always legal)
    cap = max(8, (_BLOCK_BUDGET // max(lane * itemsize, 1)) // 8 * 8)
    if _NUM_TC >= 2:                        # >=2 blocks only on 2-TC chips
        half = -(-rows // 2)
        half = -(-half // 8) * 8
        cap = min(cap, max(8, half))
    return rows if cap >= rows else cap


def _fold_lane(rows, lane):
    """Fold channels into the lane axis while lanes are narrower than a vreg.
    Valid for purely elementwise kernels only (no per-channel bias)."""
    while lane < 128 and rows >= 16 and rows % 2 == 0:
        rows //= 2
        lane *= 2
    return rows, lane


@functools.lru_cache(maxsize=None)
def _w_selection(wx, wb):
    """0/1 matrix (Wx, Wb): (row @ S) == nearest resize along W (PyTorch rule)."""
    wi = (np.arange(wb) * wx) // wb
    sel = np.zeros((wx, wb), np.float32)
    sel[wi, np.arange(wb)] = 1.0
    return sel


# ----------------------------------------------------------------------------
# Pallas kernels
# ----------------------------------------------------------------------------
def _fused_add_kernel(scale_ref, base_ref, x_ref, o_ref):
    # base/x/o: (RT, L); scale: SMEM (1,)
    s = scale_ref[0]
    o_ref[...] = (base_ref[...].astype(jnp.float32)
                  + x_ref[...].astype(jnp.float32) * s).astype(o_ref.dtype)


def _fused_add_bias_kernel(scale_ref, base_ref, x_ref, bias_ref, o_ref):
    # base/x/o: (RT, L); bias: (RT, 1); scale: SMEM (1,)
    s = scale_ref[0]
    o_ref[...] = (base_ref[...].astype(jnp.float32)
                  + x_ref[...].astype(jnp.float32) * s
                  + bias_ref[...].astype(jnp.float32)).astype(o_ref.dtype)


def _add_scalar_kernel(c_ref, x_ref, o_ref):
    o_ref[...] = (x_ref[...] + c_ref[0]).astype(o_ref.dtype)


def _resize_kernel(x_ref, selw_ref, o_ref):
    # x: (RT, Wx); selw: (Wx, Wb); o: (RT, FH, Wb).
    # W-resize = tiny selection matmul on the lane dim; H-repeat = FH unrolled
    # stores (no dense (Hx*Wx, Hb*Wb) selector, no H*W-sized MXU work).
    yw = jnp.dot(x_ref[...].astype(jnp.float32), selw_ref[...],
                 preferred_element_type=jnp.float32).astype(o_ref.dtype)
    for j in range(o_ref.shape[1]):
        o_ref[:, j, :] = yw


def _resize_add_kernel(scale_ref, base_ref, x_ref, selw_ref, o_ref):
    # base/o: (RT, FH, Wb); x: (RT, Wx); selw: (Wx, Wb)
    s = scale_ref[0]
    yw = jnp.dot(x_ref[...].astype(jnp.float32), selw_ref[...],
                 preferred_element_type=jnp.float32) * s
    for j in range(o_ref.shape[1]):
        o_ref[:, j, :] = (base_ref[:, j, :].astype(jnp.float32)
                          + yw).astype(o_ref.dtype)


def _resize_add_bias_kernel(scale_ref, base_ref, x_ref, selw_ref, bias_ref, o_ref):
    # base/o: (RT, FH, Wb); x: (RT, Wx); selw: (Wx, Wb); bias: (RT, 1)
    s = scale_ref[0]
    yw = (jnp.dot(x_ref[...].astype(jnp.float32), selw_ref[...],
                  preferred_element_type=jnp.float32) * s
          + bias_ref[...].astype(jnp.float32))
    for j in range(o_ref.shape[1]):
        o_ref[:, j, :] = (base_ref[:, j, :].astype(jnp.float32)
                          + yw).astype(o_ref.dtype)


def _make_gap_kernel(k):
    """Scaled global-average-pool over the lane dim for k same-shape inputs."""
    def kern(scale_ref, *refs):
        xs, os = refs[:k], refs[k:]
        for x_ref, o_ref in zip(xs, os):
            inv = scale_ref[0] / float(x_ref.shape[1])
            o_ref[...] = (jnp.sum(x_ref[...].astype(jnp.float32), axis=1,
                                  keepdims=True) * inv).astype(o_ref.dtype)
    return kern


# ----------------------------------------------------------------------------
# Wrappers
# ----------------------------------------------------------------------------
def fused_add(base, x, scale=1.0, bias=None):
    """base + x*scale (+ bias), same spatial size.  Pure VPU; no wrapper casts."""
    n, c, h, w = base.shape
    rows, lane = n * c, h * w
    scale_arr = jnp.asarray([scale], jnp.float32)
    if bias is None:
        rows, lane = _fold_lane(rows, lane)      # lane-densify sub-128 levels
        rt = _row_tile(rows, lane)
        out = pl.pallas_call(
            _fused_add_kernel,
            out_shape=jax.ShapeDtypeStruct((rows, lane), base.dtype),
            grid=(pl.cdiv(rows, rt),),
            in_specs=[_SMEM_SPEC,
                      pl.BlockSpec((rt, lane), lambda i: (i, 0)),
                      pl.BlockSpec((rt, lane), lambda i: (i, 0))],
            out_specs=pl.BlockSpec((rt, lane), lambda i: (i, 0)),
            compiler_params=_CPARAMS,
        )(scale_arr, base.reshape(rows, lane), x.reshape(rows, lane))
    else:
        rt = _row_tile(rows, lane)
        out = pl.pallas_call(
            _fused_add_bias_kernel,
            out_shape=jax.ShapeDtypeStruct((rows, lane), base.dtype),
            grid=(pl.cdiv(rows, rt),),
            in_specs=[_SMEM_SPEC,
                      pl.BlockSpec((rt, lane), lambda i: (i, 0)),
                      pl.BlockSpec((rt, lane), lambda i: (i, 0)),
                      pl.BlockSpec((rt, 1), lambda i: (i, 0))],
            out_specs=pl.BlockSpec((rt, lane), lambda i: (i, 0)),
            compiler_params=_CPARAMS,
        )(scale_arr, base.reshape(rows, lane), x.reshape(rows, lane),
          bias.reshape(rows, 1))
    return out.reshape(n, c, h, w)


def add_scalar(x, s):
    """x + python-float (float branch of cfg_based_adder); scalar via SMEM."""
    n, c, h, w = x.shape
    rows, lane = _fold_lane(n * c, h * w)
    rt = _row_tile(rows, lane)
    out = pl.pallas_call(
        _add_scalar_kernel,
        out_shape=jax.ShapeDtypeStruct((rows, lane), x.dtype),
        grid=(pl.cdiv(rows, rt),),
        in_specs=[_SMEM_SPEC, pl.BlockSpec((rt, lane), lambda i: (i, 0))],
        out_specs=pl.BlockSpec((rt, lane), lambda i: (i, 0)),
        compiler_params=_CPARAMS,
    )(jnp.asarray([s], jnp.float32), x.reshape(rows, lane))
    return out.reshape(n, c, h, w)


def _h_fold(x, hb):
    """Make the H ratio an exact integer repeat (fh = hb // hx).  Rare
    non-integer / downscale H ratios are pre-gathered with a cheap XLA gather
    (only the small source tensor is touched)."""
    hx = x.shape[2]
    if hb % hx != 0:
        hi = (np.arange(hb) * hx) // hb
        x = x[:, :, hi, :]
        hx = hb
    return x, hb // hx


def nearest_resize(x, size):
    """F.interpolate(x, size, mode='nearest') for NCHW inputs."""
    hb, wb = size
    n, c, hx, wx = x.shape
    if (hx, wx) == (hb, wb):
        return x
    x, fh = _h_fold(x, hb)
    hx = x.shape[2]
    rows = n * c * hx
    selw = jnp.asarray(_w_selection(wx, wb))
    rt = _row_tile(rows, fh * wb)
    out = pl.pallas_call(
        _resize_kernel,
        out_shape=jax.ShapeDtypeStruct((rows, fh, wb), x.dtype),
        grid=(pl.cdiv(rows, rt),),
        in_specs=[pl.BlockSpec((rt, wx), lambda i: (i, 0)),
                  pl.BlockSpec((wx, wb), lambda i: (0, 0))],
        out_specs=pl.BlockSpec((rt, fh, wb), lambda i: (i, 0, 0)),
        compiler_params=_CPARAMS,
    )(x.reshape(rows, wx), selw)
    return out.reshape(n, c, hb, wb)


def nearest_resize_add(base, x, scale=1.0, bias=None):
    """base + nearest_resize(x, base spatial)*scale (+ bias), fused."""
    n, c, hb, wb = base.shape
    if x.shape[-2:] == (hb, wb):
        return fused_add(base, x, scale=scale, bias=bias)
    wx = x.shape[3]
    x, fh = _h_fold(x, hb)
    hx = x.shape[2]
    rows = n * c * hx
    selw = jnp.asarray(_w_selection(wx, wb))
    scale_arr = jnp.asarray([scale], jnp.float32)
    basef = base.reshape(rows, fh, wb)
    xf = x.reshape(rows, wx)
    rt = _row_tile(rows, fh * wb)
    grid = (pl.cdiv(rows, rt),)
    common_in = [_SMEM_SPEC,
                 pl.BlockSpec((rt, fh, wb), lambda i: (i, 0, 0)),
                 pl.BlockSpec((rt, wx), lambda i: (i, 0)),
                 pl.BlockSpec((wx, wb), lambda i: (0, 0))]
    out_spec = pl.BlockSpec((rt, fh, wb), lambda i: (i, 0, 0))
    out_shape = jax.ShapeDtypeStruct((rows, fh, wb), base.dtype)
    if bias is None:
        out = pl.pallas_call(
            _resize_add_kernel, out_shape=out_shape, grid=grid,
            in_specs=common_in, out_specs=out_spec, compiler_params=_CPARAMS,
        )(scale_arr, basef, xf, selw)
    else:
        biasf = jnp.broadcast_to(bias.reshape(n * c, 1), (n * c, hx)).reshape(rows, 1)
        out = pl.pallas_call(
            _resize_add_bias_kernel, out_shape=out_shape, grid=grid,
            in_specs=common_in + [pl.BlockSpec((rt, 1), lambda i: (i, 0))],
            out_specs=out_spec, compiler_params=_CPARAMS,
        )(scale_arr, basef, xf, selw, biasf)
    return out.reshape(n, c, hb, wb)


def scaled_gap_many(xs, scale):
    """[mean(x*scale, dim=(2,3), keepdim=True) for x in xs].  One pallas_call
    per shape group, each tensor as its own operand (no HBM concat pass)."""
    out = [None] * len(xs)
    groups = {}
    for idx, x in enumerate(xs):
        groups.setdefault(x.shape, []).append(idx)
    scale_arr = jnp.asarray([scale], jnp.float32)
    for shape, idxs in groups.items():
        n, c, h, w = shape
        rows, lane = n * c, h * w
        k = len(idxs)
        rt = _row_tile(rows, lane * k)          # budget covers all k operands
        res = pl.pallas_call(
            _make_gap_kernel(k),
            out_shape=tuple(jax.ShapeDtypeStruct((rows, 1), xs[i].dtype)
                            for i in idxs),
            grid=(pl.cdiv(rows, rt),),
            in_specs=[_SMEM_SPEC]
                     + [pl.BlockSpec((rt, lane), lambda i: (i, 0))] * k,
            out_specs=tuple(pl.BlockSpec((rt, 1), lambda i: (i, 0))
                            for _ in idxs),
            compiler_params=_CPARAMS,
        )(scale_arr, *[xs[i].reshape(rows, lane) for i in idxs])
        for r, i in zip(res, idxs):
            out[i] = r.reshape(n, c, 1, 1)
    return out


# ----------------------------------------------------------------------------
# UnetHook pieces built on the kernels
# ----------------------------------------------------------------------------
class ControlTerm(NamedTuple):
    """Lazy `control*scale + gap_bias` term, fused into the adder kernel."""
    x: object             # (N, C, H, W) raw ControlNet residual
    scale: float          # guess-mode / weight scale
    bias: object          # (N, C, 1, 1) global-average-pooled term, or None


def cfg_based_adder(base, x, require_autocast):
    """Semantics of UnetHook.hook.cfg_based_adder (control term may be fused)."""
    if isinstance(x, float):
        if x == 0.0:                      # no-op: skip a full read+write pass
            return base
        return add_scalar(base, x)
    if isinstance(x, ControlTerm):
        xmap, scale, bias = x.x, x.scale, x.bias
        if scale == 0.0 and bias is None:
            return base
    else:
        xmap, scale, bias = x, 1.0, None
    if require_autocast:
        # Rare inpaint-hijack path: materialize the control term eagerly and
        # zero-pad its channels to base's channel count (plain XLA ops).
        term = xmap * jnp.asarray(scale, xmap.dtype)
        if bias is not None:
            term = term + bias
        zeros = jnp.zeros(base.shape[:2] + xmap.shape[-2:], base.dtype)
        xmap = zeros.at[:, :xmap.shape[1], ...].set(term.astype(base.dtype))
        scale, bias = 1.0, None
    if xmap.shape[-2:] == base.shape[-2:]:
        return fused_add(base, xmap, scale=scale, bias=bias)
    return nearest_resize_add(base, xmap, scale=scale, bias=bias)


def hijack_cat(a, b, dim=1):
    """TorchHijackForUnet.cat for two tensors (resize a to b's spatial size)."""
    # TODO(synk): the concat copy itself could be fused by having the resize /
    # adder kernels write straight into channel slices of a preallocated
    # output (input_output_aliases); left to XLA's concatenate for now.
    if a.shape[-2:] != b.shape[-2:]:
        a = nearest_resize(a, b.shape[-2:])
    return jnp.concatenate([a, b], axis=dim)


# ----------------------------------------------------------------------------
# Pure-JAX reference (unfused, for correctness check)
# ----------------------------------------------------------------------------
def ref_nearest_resize(x, size):
    hb, wb = size
    hx, wx = x.shape[-2:]
    hi = (np.arange(hb) * hx) // hb
    wi = (np.arange(wb) * wx) // wb
    return x[:, :, hi, :][:, :, :, wi]


def ref_cfg_based_adder(base, x, require_autocast):
    if isinstance(x, float):
        return base + x
    if require_autocast:
        zeros = jnp.zeros(base.shape[:1] + (base.shape[1],) + x.shape[-2:], base.dtype)
        zeros = zeros.at[:, : x.shape[1], ...].set(x.astype(base.dtype))
        x = zeros
    if base.shape[-2:] != x.shape[-2:]:
        x = ref_nearest_resize(x, base.shape[-2:])
    return base + x


def ref_hijack_cat(a, b, dim=1):
    if a.shape[-2:] != b.shape[-2:]:
        a = ref_nearest_resize(a, b.shape[-2:])
    return jnp.concatenate([a, b], axis=dim)


# ----------------------------------------------------------------------------
# Demo driver mimicking the hooked forward (only_mid_control=False path)
# ----------------------------------------------------------------------------
if __name__ == "__main__":
    key = jax.random.PRNGKey(0)
    N, Cx, H, W = 2, 4, 16, 16
    seq, ctx_dim = 8, 32
    (kx, kc, kctrl, kctrl2, kh, khs,
     kua, kub, kuc, kud, kue, kuf) = jax.random.split(key, 12)

    x = jax.random.normal(kx, (N, Cx, H, W), jnp.float32)
    context = jax.random.normal(kc, (N, seq, ctx_dim), jnp.float32)

    # Synthetic 13 ControlNet residuals matching a small UNet ladder.
    # TODO(synk): the real control residuals come from param.control_model (an
    # external ControlNet); synthesized deterministically here.
    ctrl_channels = [8, 8, 8, 16, 16, 16, 32, 32, 32, 32, 32, 32, 32]
    ctrl_res = [16, 16, 16, 8, 8, 8, 4, 4, 4, 2, 2, 2, 2]
    keys1 = jax.random.split(kctrl, 13)
    keys2 = jax.random.split(kctrl2, 13)
    raw_control = [0.1 * jax.random.normal(k, (N, c, r, r), jnp.float32)
                   for k, c, r in zip(keys1, ctrl_channels, ctrl_res)]
    raw_control2 = [0.1 * jax.random.normal(k, (N, c, r, r), jnp.float32)
                    for k, c, r in zip(keys2, ctrl_channels, ctrl_res)]

    # --- param 1: guess_mode ControlNet, weight 0.8 (scale fused into adder) ---
    weight1 = 0.8
    scales1 = [weight1 * 0.825 ** float(12 - i) for i in range(13)]

    # --- param 2: global_average_pooling ControlNet, weight 0.5 (fused into GAP) ---
    weight2 = 0.5
    gap2 = scaled_gap_many(raw_control2, weight2)       # one call per shape group

    # total_control kept lazily: raw_map * scale + gap_bias, fused into the adder
    total_control = [ControlTerm(c, s, g) for c, s, g in zip(raw_control, scales1, gap2)]

    # unfused pure-JAX reference of the same quantity
    control1_ref = [c * jnp.float32(s) for c, s in zip(raw_control, scales1)]
    control2_ref = [jnp.mean(c * jnp.float32(weight2), axis=(2, 3), keepdims=True)
                    for c in raw_control2]
    total_control_ref = [a + b for a, b in zip(control1_ref, control2_ref)]

    # Synthetic UNet skip connections + middle-block output.
    # TODO(synk): input_blocks / middle_block / output_blocks / time_embed belong to
    # the wrapped UNetModel (not UnetHook); identity stand-ins are used here.
    hs_keys = jax.random.split(khs, 12)
    hs = [jax.random.normal(k, (N, c, r, r), jnp.float32)
          for k, c, r in zip(hs_keys, ctrl_channels[:12], ctrl_res[:12])]
    h_mid = jax.random.normal(kh, (N, 32, 2, 2), jnp.float32)

    require_inpaint_hijack = False

    # ---- kernel pipeline ----
    ctrl = list(total_control)
    h = cfg_based_adder(h_mid, 0.0, require_inpaint_hijack)        # float path (no-op)
    h = cfg_based_adder(h, ctrl.pop(), require_inpaint_hijack)     # middle-block control
    hs_work = list(hs)
    for _ in range(12):                                            # output blocks
        hs_input, control_input = hs_work.pop(), ctrl.pop()
        h = hijack_cat(h, cfg_based_adder(hs_input, control_input,
                                          require_inpaint_hijack), dim=1)
    out = jax.block_until_ready(h)

    # ---- pure-JAX reference ----
    ctrl_r = list(total_control_ref)
    h_r = ref_cfg_based_adder(h_mid, 0.0, require_inpaint_hijack)
    h_r = ref_cfg_based_adder(h_r, ctrl_r.pop(), require_inpaint_hijack)
    hs_r = list(hs)
    for _ in range(12):
        hs_input, control_input = hs_r.pop(), ctrl_r.pop()
        h_r = ref_hijack_cat(h_r, ref_cfg_based_adder(hs_input, control_input,
                                                      require_inpaint_hijack), dim=1)
    out_ref = jax.block_until_ready(h_r)

    assert out.shape == out_ref.shape, (out.shape, out_ref.shape)
    np.testing.assert_allclose(np.asarray(out), np.asarray(out_ref),
                               rtol=1e-4, atol=1e-4)

    # ---- extra path checks (paths not exercised by the demo pipeline) ----
    xa = jax.random.normal(kua, (2, 16, 4, 4), jnp.float32)
    ya = jax.random.normal(kub, (2, 16, 4, 4), jnp.float32)
    np.testing.assert_allclose(np.asarray(fused_add(xa, ya, scale=1.3)),
                               np.asarray(xa + 1.3 * ya), rtol=1e-5, atol=1e-5)
    np.testing.assert_allclose(np.asarray(add_scalar(xa, 0.5)),
                               np.asarray(xa + 0.5), rtol=1e-6, atol=1e-6)
    xb = jax.random.normal(kuc, (2, 3, 5, 6), jnp.float32)      # non-integer H ratio
    np.testing.assert_allclose(np.asarray(nearest_resize(xb, (8, 9))),
                               np.asarray(ref_nearest_resize(xb, (8, 9))),
                               rtol=1e-6, atol=1e-6)
    bb = jax.random.normal(kud, (2, 4, 8, 8), jnp.float32)
    xc = jax.random.normal(kue, (2, 4, 4, 4), jnp.float32)
    gb = jax.random.normal(kuf, (2, 4, 1, 1), jnp.float32)
    want_nb = bb + 0.7 * ref_nearest_resize(xc, (8, 8))
    np.testing.assert_allclose(np.asarray(nearest_resize_add(bb, xc, scale=0.7)),
                               np.asarray(want_nb), rtol=1e-5, atol=1e-5)
    want_b = want_nb + gb
    np.testing.assert_allclose(
        np.asarray(nearest_resize_add(bb, xc, scale=0.7, bias=gb)),
        np.asarray(want_b), rtol=1e-5, atol=1e-5)

    print("KERNEL_OK")
</pallas_src>

<mosaic_0001>
module attributes {stable_mosaic.version = 11 : i64} {
  func.func @kern(%arg0: i32, %arg1: memref<1xf32, #tpu.memory_space<smem>>, %arg2: memref<16x256xf32, #tpu.memory_space<vmem>>, %arg3: memref<16x256xf32, #tpu.memory_space<vmem>>, %arg4: memref<16x256xf32, #tpu.memory_space<vmem>>, %arg5: memref<16x1xf32, #tpu.memory_space<vmem>>, %arg6: memref<16x1xf32, #tpu.memory_space<vmem>>, %arg7: memref<16x1xf32, #tpu.memory_space<vmem>>) attributes {dimension_semantics = [#tpu.dimension_semantics<parallel>], iteration_bounds = array<i64: 1>, scalar_prefetch = 0 : i64, scratch_operands = 0 : i64, tpu.core_type = #tpu.core_type<tc>, window_params = [{transform_indices = @transform_0, window_bounds = array<i64: 1>}, {transform_indices = @transform_1, window_bounds = array<i64: 16, 256>}, {transform_indices = @transform_2, window_bounds = array<i64: 16, 256>}, {transform_indices = @transform_3, window_bounds = array<i64: 16, 256>}, {transform_indices = @transform_4, window_bounds = array<i64: 16, 1>}, {transform_indices = @transform_5, window_bounds = array<i64: 16, 1>}, {transform_indices = @transform_6, window_bounds = array<i64: 16, 1>}]} {
    %c0 = arith.constant 0 : index
    %0 = memref.load %arg1[%c0] : memref<1xf32, #tpu.memory_space<smem>>
    %cst = arith.constant 2.560000e+02 : f32
    %1 = arith.divf %0, %cst : f32
    %c0_0 = arith.constant 0 : index
    %c0_1 = arith.constant 0 : index
    %2 = vector.load %arg2[%c0_0, %c0_1] : memref<16x256xf32, #tpu.memory_space<vmem>>, vector<16x256xf32>
    %cst_2 = arith.constant dense<0.000000e+00> : vector<16xf32>
    %3 = vector.multi_reduction <add>, %2, %cst_2 [1] : vector<16x256xf32> to vector<16xf32>
    %4 = vector.shape_cast %3 : vector<16xf32> to vector<16x1xf32>
    %5 = vector.broadcast %1 : f32 to vector<16x1xf32>
    %6 = arith.mulf %4, %5 : vector<16x1xf32>
    %c0_3 = arith.constant 0 : index
    %c0_4 = arith.constant 0 : index
    %7 = vector.load %arg5[%c0_3, %c0_4] : memref<16x1xf32, #tpu.memory_space<vmem>>, vector<16x1xf32>
    tpu.vector_store %arg5[%c0_3, %c0_4], %6 {strides = array<i32>} : memref<16x1xf32, #tpu.memory_space<vmem>>, vector<16x1xf32>,
    %c0_5 = arith.constant 0 : index
    %8 = memref.load %arg1[%c0_5] : memref<1xf32, #tpu.memory_space<smem>>
    %cst_6 = arith.constant 2.560000e+02 : f32
    %9 = arith.divf %8, %cst_6 : f32
    %c0_7 = arith.constant 0 : index
    %c0_8 = arith.constant 0 : index
    %10 = vector.load %arg3[%c0_7, %c0_8] : memref<16x256xf32, #tpu.memory_space<vmem>>, vector<16x256xf32>
    %cst_9 = arith.constant dense<0.000000e+00> : vector<16xf32>
    %11 = vector.multi_reduction <add>, %10, %cst_9 [1] : vector<16x256xf32> to vector<16xf32>
    %12 = vector.shape_cast %11 : vector<16xf32> to vector<16x1xf32>
    %13 = vector.broadcast %9 : f32 to vector<16x1xf32>
    %14 = arith.mulf %12, %13 : vector<16x1xf32>
    %c0_10 = arith.constant 0 : index
    %c0_11 = arith.constant 0 : index
    %15 = vector.load %arg6[%c0_10, %c0_11] : memref<16x1xf32, #tpu.memory_space<vmem>>, vector<16x1xf32>
    tpu.vector_store %arg6[%c0_10, %c0_11], %14 {strides = array<i32>} : memref<16x1xf32, #tpu.memory_space<vmem>>, vector<16x1xf32>,
    %c0_12 = arith.constant 0 : index
    %16 = memref.load %arg1[%c0_12] : memref<1xf32, #tpu.memory_space<smem>>
    %cst_13 = arith.constant 2.560000e+02 : f32
    %17 = arith.divf %16, %cst_13 : f32
    %c0_14 = arith.constant 0 : index
    %c0_15 = arith.constant 0 : index
    %18 = vector.load %arg4[%c0_14, %c0_15] : memref<16x256xf32, #tpu.memory_space<vmem>>, vector<16x256xf32>
    %cst_16 = arith.constant dense<0.000000e+00> : vector<16xf32>
    %19 = vector.multi_reduction <add>, %18, %cst_16 [1] : vector<16x256xf32> to vector<16xf32>
    %20 = vector.shape_cast %19 : vector<16xf32> to vector<16x1xf32>
    %21 = vector.broadcast %17 : f32 to vector<16x1xf32>
    %22 = arith.mulf %20, %21 : vector<16x1xf32>
    %c0_17 = arith.constant 0 : index
    %c0_18 = arith.constant 0 : index
    %23 = vector.load %arg7[%c0_17, %c0_18] : memref<16x1xf32, #tpu.memory_space<vmem>>, vector<16x1xf32>
    tpu.vector_store %arg7[%c0_17, %c0_18], %22 {strides = array<i32>} : memref<16x1xf32, #tpu.memory_space<vmem>>, vector<16x1xf32>,
    return
  }
  func.func @transform_0(%arg0: i32) -> i32 {
    %c0_i32 = arith.constant 0 : i32
    %c0_i32_0 = arith.constant 0 : i32
    return %c0_i32 : i32
  }
  func.func @transform_1(%arg0: i32) -> (i32, i32) {
    %c0_i32 = arith.constant 0 : i32
    %c0_i32_0 = arith.constant 0 : i32
    return %arg0, %c0_i32 : i32, i32
  }
  func.func @transform_2(%arg0: i32) -> (i32, i32) {
    %c0_i32 = arith.constant 0 : i32
    %c0_i32_0 = arith.constant 0 : i32
    return %arg0, %c0_i32 : i32, i32
  }
  func.func @transform_3(%arg0: i32) -> (i32, i32) {
    %c0_i32 = arith.constant 0 : i32
    %c0_i32_0 = arith.constant 0 : i32
    return %arg0, %c0_i32 : i32, i32
  }
  func.func @transform_4(%arg0: i32) -> (i32, i32) {
    %c0_i32 = arith.constant 0 : i32
    %c0_i32_0 = arith.constant 0 : i32
    return %arg0, %c0_i32 : i32, i32
  }
  func.func @transform_5(%arg0: i32) -> (i32, i32) {
    %c0_i32 = arith.constant 0 : i32
    %c0_i32_0 = arith.constant 0 : i32
    return %arg0, %c0_i32 : i32, i32
  }
  func.func @transform_6(%arg0: i32) -> (i32, i32) {
    %c0_i32 = arith.constant 0 : i32
    %c0_i32_0 = arith.constant 0 : i32
    return %arg0, %c0_i32 : i32, i32
  }
}

</mosaic_0001>

<bundles_post_ra>
// kernel: tpu_custom_call.1
= control target key start
LH: loop header
LB: loop body
LE: loop exit
PB: predicated region body
PF: predicated region fallthrough
CT: control target
= control target key end

     0   :  { %13 = vsyncpa [#allocation4], 0  ;;  %s321_s0 = inlined_call_operand.<no memory space> [shape: f32[1], index: 0, kind: input, shape index: {}]   ;;  %s322_s1 = inlined_call_operand.hbm [shape: f32[16,256], index: 1, kind: input, shape index: {}]   ;;  %s323_s2 = inlined_call_operand.hbm [shape: f32[16,256], index: 2, kind: input, shape index: {}]   ;;  %s324_s3 = inlined_call_operand.hbm [shape: f32[16,256], index: 3, kind: input, shape index: {}]   ;;  %s325_s4 = inlined_call_operand.vmem [shape: f32[16,1], index: 4, kind: output, shape index: {0}]   ;;  %s326_s5 = inlined_call_operand.vmem [shape: f32[16,1], index: 5, kind: output, shape index: {1}]   ;;  %s327_s6 = inlined_call_operand.vmem [shape: f32[16,1], index: 6, kind: output, shape index: {2}]  }
   0x1   :  { %14 = vsyncpa [#allocation6], 0  ;;  %s34_s23 = sshll.u32 %s323_s2, 4  ;;  %s244_s24 = smov [#allocation5]   ;;  %s35_s23 = int_to_ptr.hbm [resolvable:$true] %s34_s23 }
   0x2   :  { %s36_s25 = sshll.u32 %s244_s24, 4  ;;  %s21_s28 = sshll.u32 %s322_s1, 4  ;;  %s37_s25 = int_to_ptr.vmem [resolvable:$true] %s36_s25  ;;  %s22_s28 = int_to_ptr.hbm [resolvable:$true] %s21_s28 }
   0x3   :  { %s245_s29 = smov 256   ;;  %s246_s30 = smov 16  }
   0x4   :  { %42 = dma.hbm_to_vmem [thread:$0]  %s35_s23, 512, %s37_s25, [#allocation6], %s245_s29, %s245_s29, %s246_s30  }
   0x5   :  { %s247_s7 = smov [#allocation3]   ;;  %s47_s11 = sshll.u32 %s324_s3, 4  ;;  %s48_s11 = int_to_ptr.hbm [resolvable:$true] %s47_s11 }
   0x6   :  { %s23_s8 = sshll.u32 %s247_s7, 4  ;;  %s248_s2 = smov [#allocation7]   ;;  %s24_s8 = int_to_ptr.vmem [resolvable:$true] %s23_s8 }
   0x7   :  { %29 = dma.hbm_to_vmem [thread:$0]  %s22_s28, 512, %s24_s8, [#allocation4], %s245_s29, %s245_s29, %s246_s30  }
   0x8   :  { %s49_s12 = sshll.u32 %s248_s2, 4  ;;  %s50_s12 = int_to_ptr.vmem [resolvable:$true] %s49_s12 }
   0x9   :  { %55 = dma.hbm_to_vmem [thread:$0]  %s48_s11, 512, %s50_s12, [#allocation6], %s245_s29, %s245_s29, %s246_s30  }
   0xa   :  { %240 = dma.done.wait [#allocation4], 512  }
   0xb   :  { %241 = vsyncadd [#allocation4], 4294966784 }
   0xc   :  { %242 = dma.done.wait [#allocation6], 1024  }
   0xd   :  { %243 = vsyncadd [#allocation6], 4294966272  ;;  %v249_v0 = vmov 256.0   ;;  %v129_v2 = vld [vmem:[#allocation7] sm:$0xff]  ;;  %v130_v3 = vld [vmem:[#allocation7 + $0x8] sm:$0xff]  ;;  %vm91_vm1 = vcmask 7168  }
   0xe   :  { %166 = vrcp.f32 %v249_v0  ;;  %v104_v4 = vld [vmem:[#allocation5] sm:$0xff]  ;;  %v133_v5 = vadd.f32 %v130_v3, %v129_v2  ;;  %v105_v6 = vld [vmem:[#allocation5 + $0x8] sm:$0xff]  ;;  %v131_v13 = vld [vmem:[#allocation7 + $0x10] sm:$0xff] }
   0xf   :  { %v78_v7 = vld [vmem:[#allocation3] sm:$0xff]  ;;  %v79_v8 = vld [vmem:[#allocation3 + $0x8] sm:$0xff]  ;;  %v108_v10 = vadd.f32 %v105_v6, %v104_v4  ;;  %v132_v14 = vld [vmem:[#allocation7 + $0x18] sm:$0xff] }
  0x10   :  { %v82_v11 = vadd.f32 %v79_v8, %v78_v7  ;;  %134 = vadd.xlane.f32.xlu2 %v133_v5  ;;  %v106_v15 = vld [vmem:[#allocation5 + $0x10] sm:$0xff]  ;;  %v107_v16 = vld [vmem:[#allocation5 + $0x18] sm:$0xff]  ;;  %v136_v20 = vadd.f32 %v132_v14, %v131_v13 }
  0x11   :  { %109 = vadd.xlane.f32.xlu1 %v108_v10  ;;  %v80_v17 = vld [vmem:[#allocation3 + $0x10] sm:$0xff]  ;;  %v81_v18 = vld [vmem:[#allocation3 + $0x18] sm:$0xff]  ;;  %v111_v22 = vadd.f32 %v107_v16, %v106_v15 }
  0x12   :  { %83 = vadd.xlane.f32.xlu0 %v82_v11  ;;  %v85_v23 = vadd.f32 %v81_v18, %v80_v17 }
  0x14   :  { %v167_v1 = vpop.eup %166 }
  0x15   :  { %v70_v9 = vmul.f32 256.0, %v167_v1  ;;  %vm74_vm0 = vweird.f32 %v167_v1 }
  0x17   :  { %v71_v12 = vsub.f32 1.0, %v70_v9 }
  0x18   :  { %137 = vadd.xlane.f32.xlu2 %v136_v20 }
  0x19   :  { %v72_v19 = vmul.f32 %v167_v1, %v71_v12  ;;  %112 = vadd.xlane.f32.xlu1 %v111_v22 }
  0x1a   :  { %86 = vadd.xlane.f32.xlu0 %v85_v23 }
  0x1b   :  { %v73_v21 = vadd.f32 %v167_v1, %v72_v19 }
  0x1d   :  { %v75_v24 = vsel %vm74_vm0, %v167_v1, %v73_v21 }
  0x1e   :  { %158 = vpush %v75_v24 }
  0x4f   :  { %s159_s1 = spop %158 }
  0x50   :  { %s77_s14 = smul.f32 %s159_s1, %s321_s0 }
  0x52   :  { %v88_v25 = vstv %s77_s14 }
  0x83   :  { %v135_v26 = vpop.xlane.xlu2 %134 }
  0x84   :  { %v140_v27 = vmul.f32 %v135_v26, %v88_v25  ;;  %v110_v28 = vpop.xlane.xlu1 %109 }
  0x85   :  { %v84_v29 = vpop.xlane.xlu0 %83  ;;  %v115_v30 = vmul.f32 %v110_v28, %v88_v25 }
  0x86   :  { %v89_v31 = vmul.f32 %v88_v25, %v84_v29  ;;  %142 = vst.msk [vmem:[%s327_s6] sm:$0xff] %vm91_vm1, %v140_v27 }
  0x87   :  { %117 = vst.msk [vmem:[%s326_s5] sm:$0xff] %vm91_vm1, %v115_v30 }
  0x88   :  { %92 = vst.msk [vmem:[%s325_s4] sm:$0xff] %vm91_vm1, %v89_v31 }
  0x8b   :  { %v138_v32 = vpop.xlane.xlu2 %137 }
  0x8c   :  { %v141_v33 = vmul.f32 %v138_v32, %v88_v25  ;;  %v113_v34 = vpop.xlane.xlu1 %112 }
  0x8d   :  { %v87_v35 = vpop.xlane.xlu0 %86  ;;  %v116_v36 = vmul.f32 %v113_v34, %v88_v25 }
  0x8e   :  { %v90_v37 = vmul.f32 %v88_v25, %v87_v35  ;;  %143 = vst.msk [vmem:[%s327_s6 + $0x8] sm:$0xff] %vm91_vm1, %v141_v33 }
  0x8f   :  { %118 = vst.msk [vmem:[%s326_s5 + $0x8] sm:$0xff] %vm91_vm1, %v116_v36 }
  0x90   :  { %93 = vst.msk [vmem:[%s325_s4 + $0x8] sm:$0xff] %vm91_vm1, %v90_v37 }
  0x91   :  { %156 = vsyncpa [#allocation4], 1 }
  0x92   :  { %157 = vsyncpa [#allocation6], 1 }

</bundles_post_ra>
